<compile_context>
chip_gen: v7x
topology: tpu7x:2x2x1
jax: 0.10.0
libtpu: 0.0.40
codegen_flags: <defaults>
</compile_context>

<pallas_src>
import functools

import jax
import jax.numpy as jnp
import numpy as np
from jax.experimental import pallas as pl
from jax.experimental.pallas import tpu as pltpu

_NEG = -1e30  # additive mask for invalid conv positions (finite to avoid inf arithmetic)


def _round_up(x, m):
    return (x + m - 1) // m * m


def cnn_fused_kernel(x_ref, w_conv_ref, b_conv_ref, mask_ref, w_fc_ref, b_fc_ref, o_ref,
                     *, f_max, n_pos_pad, word_dim):
    """Fused conv(all filter sizes) + ReLU + max-pool-over-time + FC for one batch tile.

    x_ref:      (BT, L_pad, D)       f32 embedded tokens (zero padded along L)
    w_conv_ref: (f_max*D, N_pad)     packed conv weights (all banks), b_conv_ref: (1, N_pad)
    mask_ref:   (n_pos_pad, N_pad)   additive position-validity mask (0 / -1e30)
    w_fc_ref:   (N_pad, C_pad)       padded FC weight,  b_fc_ref: (1, C_pad)
    o_ref:      (BT, C_pad)          lane-dense logits
    """
    bt = x_ref.shape[0]
    n_pad = w_conv_ref.shape[1]

    x = x_ref[...]
    w = w_conv_ref[...]

    # Shift-accumulation conv over word positions:
    #   s[b, t, :] = sum_k x[b, t + k, :] @ W[k]     (all filter banks packed along N)
    # Slices are along the sublane (L) axis; reshapes are tile-aligned (n_pos_pad % 8 == 0).
    acc = jnp.zeros((bt * n_pos_pad, n_pad), jnp.float32)
    for k in range(f_max):  # static, tiny trip count (max filter width)
        xs = x[:, k:k + n_pos_pad, :].reshape(bt * n_pos_pad, word_dim)
        wk = w[k * word_dim:(k + 1) * word_dim, :]
        acc = acc + jnp.dot(xs.astype(w.dtype), wk, preferred_element_type=jnp.float32)

    s = acc.reshape(bt, n_pos_pad, n_pad) + mask_ref[...]   # mask invalid / padded positions
    m = jnp.max(s, axis=1)                                  # max-pool over time -> (BT, N_pad)
    feat = jnp.maximum(m + b_conv_ref[...], 0.0)            # bias + ReLU hoisted out of the loop

    w_fc = w_fc_ref[...]
    logits = jnp.dot(feat.astype(w_fc.dtype), w_fc,
                     preferred_element_type=jnp.float32) + b_fc_ref[...]
    o_ref[...] = logits.astype(o_ref.dtype)


def cnn_forward(inp, emb_matrix, conv_ws, conv_bs, fc_w_t, fc_b, *,
                filters, word_dim, sent_len, block_batch=128,
                param_dtype=jnp.float32):
    """Forward pass of the CNN module (eval mode). Returns (B, CLASS_SIZE) logits.

    conv_ws[i]: (FILTERS[i]*WORD_DIM, FILTER_NUM[i])  == PyTorch conv_i weight transposed
    fc_w_t:     (sum(FILTER_NUM), CLASS_SIZE)         == PyTorch fc.weight.T
    """
    filters = tuple(int(f) for f in filters)
    filter_num = tuple(int(w.shape[1]) for w in conv_ws)
    f_total = sum(filter_num)
    f_max = max(filters)
    f_min = min(filters)
    class_size = int(fc_w_t.shape[1])

    LANE = 128
    SUBLANE = 8
    n_pad = _round_up(f_total, LANE)                   # packed feature lanes
    c_pad = _round_up(class_size, LANE)                # FC output lanes
    n_pos_pad = _round_up(sent_len - f_min + 1, SUBLANE)
    l_pad = n_pos_pad + f_max - 1                      # padded sentence length in-kernel
    k_dim = f_max * word_dim

    # ---- pack parameters once: all filter banks share one lane-dense matmul ----
    w_conv = jnp.zeros((k_dim, n_pad), jnp.float32)
    b_conv = jnp.zeros((1, n_pad), jnp.float32)
    pos_mask = np.zeros((n_pos_pad, n_pad), np.float32)
    off = 0
    for i, (f, fn) in enumerate(zip(filters, filter_num)):
        w_conv = w_conv.at[:f * word_dim, off:off + fn].set(conv_ws[i].astype(jnp.float32))
        b_conv = b_conv.at[:, off:off + fn].set(conv_bs[i].reshape(1, fn).astype(jnp.float32))
        pos_mask[sent_len - f + 1:, off:off + fn] = _NEG   # positions past (L - f) are invalid
        off += fn
    pos_mask = jnp.asarray(pos_mask)

    w_fc = jnp.zeros((n_pad, c_pad), jnp.float32).at[:f_total, :class_size].set(
        fc_w_t.astype(jnp.float32))
    b_fc = jnp.zeros((1, c_pad), jnp.float32).at[:, :class_size].set(
        fc_b.reshape(1, class_size).astype(jnp.float32))
    # bf16 storage (param_dtype=jnp.bfloat16) halves weight DMA bytes on v6e/v7x;
    # accumulation (preferred_element_type) and elementwise math stay f32 (v5e-safe).
    w_conv = w_conv.astype(param_dtype)
    w_fc = w_fc.astype(param_dtype)

    # ---- embedding lookup + batch / length padding (glue, plain JAX) ----
    # TODO(synk): fuse the embedding gather into the kernel (scalar-prefetch token ids +
    # DMA gather of table rows) to remove the last activation HBM round-trip.
    batch = inp.shape[0]
    x = jnp.take(emb_matrix, inp, axis=0).astype(jnp.float32)        # (B, L, D)
    bt = min(block_batch, _round_up(batch, SUBLANE))                 # batch tile (>= 8 rows)
    b_pad = _round_up(batch, bt)
    x = jnp.pad(x, ((0, b_pad - batch), (0, l_pad - sent_len), (0, 0)))

    kernel = functools.partial(cnn_fused_kernel, f_max=f_max,
                               n_pos_pad=n_pos_pad, word_dim=word_dim)

    out = pl.pallas_call(
        kernel,
        out_shape=jax.ShapeDtypeStruct((b_pad, c_pad), jnp.float32),
        grid_spec=pltpu.PrefetchScalarGridSpec(
            num_scalar_prefetch=0,
            grid=(b_pad // bt,),
            in_specs=[
                pl.BlockSpec((bt, l_pad, word_dim), lambda i: (i, 0, 0)),   # x batch tile
                pl.BlockSpec((k_dim, n_pad), lambda i: (0, 0)),             # packed conv W
                pl.BlockSpec((1, n_pad), lambda i: (0, 0)),                 # packed conv b
                pl.BlockSpec((n_pos_pad, n_pad), lambda i: (0, 0)),         # position mask
                pl.BlockSpec((n_pad, c_pad), lambda i: (0, 0)),             # fc W
                pl.BlockSpec((1, c_pad), lambda i: (0, 0)),                 # fc b
            ],
            out_specs=pl.BlockSpec((bt, c_pad), lambda i: (i, 0)),
        ),
        compiler_params=pltpu.CompilerParams(
            dimension_semantics=("parallel",),   # batch tiles shard across TCs on v7x
        ),
    )(x, w_conv, b_conv, pos_mask, w_fc, b_fc)

    # F.dropout in eval mode == identity.  # TODO(synk): training-mode dropout not implemented.
    # TODO(synk): 'multichannel' (second embedding) model variant not implemented.
    return out[:batch, :class_size]


def cnn_reference(inp, emb_matrix, conv_ws, conv_bs, fc_w_t, fc_b, *,
                  filters, word_dim, sent_len):
    """Plain-JAX reference matching the PyTorch forward (eval mode)."""
    x = jnp.take(emb_matrix, inp, axis=0)
    x_flat = x.reshape(x.shape[0], sent_len * word_dim)
    feats = []
    for i, f in enumerate(filters):
        n_pos = sent_len - f + 1
        cols = []
        for t in range(n_pos):
            win = x_flat[:, t * word_dim:(t + f) * word_dim]
            cols.append(win @ conv_ws[i] + conv_bs[i])
        conv = jnp.stack(cols, axis=1)                       # (B, n_pos, FN_i)
        feats.append(jnp.max(jax.nn.relu(conv), axis=1))     # (B, FN_i)
    feat = jnp.concatenate(feats, axis=1)
    return feat @ fc_w_t + fc_b


if __name__ == "__main__":
    # Small, forward-consistent hyperparameters.
    BATCH_SIZE = 2
    MAX_SENT_LEN = 8
    WORD_DIM = 32
    VOCAB_SIZE = 20
    CLASS_SIZE = 4
    FILTERS = [2, 3, 4]
    FILTER_NUM = [5, 6, 7]

    key = jax.random.PRNGKey(0)
    k_emb, k_inp, k_fcw, k_fcb, *k_conv = jax.random.split(key, 4 + len(FILTERS))

    # Embedding table (VOCAB_SIZE + 2, WORD_DIM); padding_idx = VOCAB_SIZE + 1 is zeroed.
    emb_matrix = 0.1 * jax.random.normal(k_emb, (VOCAB_SIZE + 2, WORD_DIM), jnp.float32)
    emb_matrix = emb_matrix.at[VOCAB_SIZE + 1].set(0.0)

    # Conv1d(1, FILTER_NUM[i], kernel=WORD_DIM*FILTERS[i], stride=WORD_DIM) parameters,
    # stored transposed as (FILTERS[i]*WORD_DIM, FILTER_NUM[i]).
    conv_ws, conv_bs = [], []
    for i in range(len(FILTERS)):
        kw, kb = jax.random.split(k_conv[i], 2)
        conv_ws.append(
            0.1 * jax.random.normal(kw, (FILTERS[i] * WORD_DIM, FILTER_NUM[i]), jnp.float32))
        conv_bs.append(
            0.1 * jax.random.normal(kb, (1, FILTER_NUM[i]), jnp.float32))

    # Linear(sum(FILTER_NUM), CLASS_SIZE), stored transposed as (sum(FILTER_NUM), CLASS_SIZE).
    fc_w_t = 0.1 * jax.random.normal(k_fcw, (sum(FILTER_NUM), CLASS_SIZE), jnp.float32)
    fc_b = 0.1 * jax.random.normal(k_fcb, (1, CLASS_SIZE), jnp.float32)

    # Token ids in [0, VOCAB_SIZE + 1].
    inp = jax.random.randint(k_inp, (BATCH_SIZE, MAX_SENT_LEN), 0, VOCAB_SIZE + 2, jnp.int32)

    fwd = jax.jit(functools.partial(
        cnn_forward,
        filters=tuple(FILTERS), word_dim=WORD_DIM, sent_len=MAX_SENT_LEN,
        # param_dtype=jnp.bfloat16  # on v6e/v7x: halves weight DMA bytes, f32 accumulation kept
    ))
    logits = fwd(inp, emb_matrix, conv_ws, conv_bs, fc_w_t, fc_b)
    jax.block_until_ready(logits)
    assert logits.shape == (BATCH_SIZE, CLASS_SIZE)

    ref = cnn_reference(inp, emb_matrix, conv_ws, conv_bs, fc_w_t, fc_b,
                        filters=FILTERS, word_dim=WORD_DIM, sent_len=MAX_SENT_LEN)
    np.testing.assert_allclose(np.asarray(logits), np.asarray(ref), rtol=5e-2, atol=5e-3)
    print("KERNEL_OK")
</pallas_src>

<mosaic_0001>
module attributes {stable_mosaic.version = 11 : i64} {
  func.func @cnn_fused_kernel(%arg0: i32, %arg1: memref<8x11x32xf32, #tpu.memory_space<vmem>>, %arg2: memref<128x128xf32, #tpu.memory_space<vmem>>, %arg3: memref<1x128xf32, #tpu.memory_space<vmem>>, %arg4: memref<8x128xf32, #tpu.memory_space<vmem>>, %arg5: memref<128x128xf32, #tpu.memory_space<vmem>>, %arg6: memref<1x128xf32, #tpu.memory_space<vmem>>, %arg7: memref<8x128xf32, #tpu.memory_space<vmem>>) attributes {dimension_semantics = [#tpu.dimension_semantics<parallel>], iteration_bounds = array<i64: 1>, scalar_prefetch = 0 : i64, scratch_operands = 0 : i64, tpu.core_type = #tpu.core_type<tc>, window_params = [{transform_indices = @transform_0, window_bounds = array<i64: 8, 11, 32>}, {pipeline_mode = #tpu.pipeline_mode<synchronous>, transform_indices = @transform_1, window_bounds = array<i64: 128, 128>}, {pipeline_mode = #tpu.pipeline_mode<synchronous>, transform_indices = @transform_2, window_bounds = array<i64: 1, 128>}, {pipeline_mode = #tpu.pipeline_mode<synchronous>, transform_indices = @transform_3, window_bounds = array<i64: 8, 128>}, {pipeline_mode = #tpu.pipeline_mode<synchronous>, transform_indices = @transform_4, window_bounds = array<i64: 128, 128>}, {pipeline_mode = #tpu.pipeline_mode<synchronous>, transform_indices = @transform_5, window_bounds = array<i64: 1, 128>}, {transform_indices = @transform_6, window_bounds = array<i64: 8, 128>}]} {
    %c0 = arith.constant 0 : index
    %c0_0 = arith.constant 0 : index
    %c0_1 = arith.constant 0 : index
    %0 = vector.load %arg1[%c0, %c0_0, %c0_1] : memref<8x11x32xf32, #tpu.memory_space<vmem>>, vector<8x11x32xf32>
    %c0_2 = arith.constant 0 : index
    %c0_3 = arith.constant 0 : index
    %1 = vector.load %arg2[%c0_2, %c0_3] : memref<128x128xf32, #tpu.memory_space<vmem>>, vector<128x128xf32>
    %cst = arith.constant 0.000000e+00 : f32
    %2 = vector.broadcast %cst : f32 to vector<64x128xf32>
    %3 = vector.extract_strided_slice %0 {offsets = [0, 0, 0], sizes = [8, 8, 32], strides = [1, 1, 1]} : vector<8x11x32xf32> to vector<8x8x32xf32>
    %4 = vector.shape_cast %3 : vector<8x8x32xf32> to vector<64x32xf32>
    %5 = vector.extract_strided_slice %1 {offsets = [0, 0], sizes = [32, 128], strides = [1, 1]} : vector<128x128xf32> to vector<32x128xf32>
    %cst_4 = arith.constant dense<0.000000e+00> : vector<64x128xf32>
    %6 = tpu.matmul %4, %5, %cst_4 {dimension_numbers = #tpu.dot_dimension_numbers<[1], [0], [0], [1], [0, 0, 1, 1], [], []>} : vector<64x32xf32>, vector<32x128xf32>, vector<64x128xf32> -> vector<64x128xf32>
    %7 = arith.addf %2, %6 : vector<64x128xf32>
    %8 = vector.extract_strided_slice %0 {offsets = [0, 1, 0], sizes = [8, 8, 32], strides = [1, 1, 1]} : vector<8x11x32xf32> to vector<8x8x32xf32>
    %9 = vector.shape_cast %8 : vector<8x8x32xf32> to vector<64x32xf32>
    %10 = vector.extract_strided_slice %1 {offsets = [32, 0], sizes = [32, 128], strides = [1, 1]} : vector<128x128xf32> to vector<32x128xf32>
    %cst_5 = arith.constant dense<0.000000e+00> : vector<64x128xf32>
    %11 = tpu.matmul %9, %10, %cst_5 {dimension_numbers = #tpu.dot_dimension_numbers<[1], [0], [0], [1], [0, 0, 1, 1], [], []>} : vector<64x32xf32>, vector<32x128xf32>, vector<64x128xf32> -> vector<64x128xf32>
    %12 = arith.addf %7, %11 : vector<64x128xf32>
    %13 = vector.extract_strided_slice %0 {offsets = [0, 2, 0], sizes = [8, 8, 32], strides = [1, 1, 1]} : vector<8x11x32xf32> to vector<8x8x32xf32>
    %14 = vector.shape_cast %13 : vector<8x8x32xf32> to vector<64x32xf32>
    %15 = vector.extract_strided_slice %1 {offsets = [64, 0], sizes = [32, 128], strides = [1, 1]} : vector<128x128xf32> to vector<32x128xf32>
    %cst_6 = arith.constant dense<0.000000e+00> : vector<64x128xf32>
    %16 = tpu.matmul %14, %15, %cst_6 {dimension_numbers = #tpu.dot_dimension_numbers<[1], [0], [0], [1], [0, 0, 1, 1], [], []>} : vector<64x32xf32>, vector<32x128xf32>, vector<64x128xf32> -> vector<64x128xf32>
    %17 = arith.addf %12, %16 : vector<64x128xf32>
    %18 = vector.extract_strided_slice %0 {offsets = [0, 3, 0], sizes = [8, 8, 32], strides = [1, 1, 1]} : vector<8x11x32xf32> to vector<8x8x32xf32>
    %19 = vector.shape_cast %18 : vector<8x8x32xf32> to vector<64x32xf32>
    %20 = vector.extract_strided_slice %1 {offsets = [96, 0], sizes = [32, 128], strides = [1, 1]} : vector<128x128xf32> to vector<32x128xf32>
    %cst_7 = arith.constant dense<0.000000e+00> : vector<64x128xf32>
    %21 = tpu.matmul %19, %20, %cst_7 {dimension_numbers = #tpu.dot_dimension_numbers<[1], [0], [0], [1], [0, 0, 1, 1], [], []>} : vector<64x32xf32>, vector<32x128xf32>, vector<64x128xf32> -> vector<64x128xf32>
    %22 = arith.addf %17, %21 : vector<64x128xf32>
    %23 = vector.shape_cast %22 : vector<64x128xf32> to vector<8x8x128xf32>
    %c0_8 = arith.constant 0 : index
    %c0_9 = arith.constant 0 : index
    %24 = vector.load %arg4[%c0_8, %c0_9] : memref<8x128xf32, #tpu.memory_space<vmem>>, vector<8x128xf32>
    %25 = vector.shape_cast %24 : vector<8x128xf32> to vector<1x8x128xf32>
    %26 = vector.broadcast %25 : vector<1x8x128xf32> to vector<8x8x128xf32>
    %27 = arith.addf %23, %26 : vector<8x8x128xf32>
    %cst_10 = arith.constant dense<0xFF800000> : vector<8x128xf32>
    %28 = vector.multi_reduction <maximumf>, %27, %cst_10 [1] : vector<8x8x128xf32> to vector<8x128xf32>
    %c0_11 = arith.constant 0 : index
    %c0_12 = arith.constant 0 : index
    %29 = vector.load %arg3[%c0_11, %c0_12] : memref<1x128xf32, #tpu.memory_space<vmem>>, vector<1x128xf32>
    %30 = vector.broadcast %29 : vector<1x128xf32> to vector<8x128xf32>
    %31 = arith.addf %28, %30 : vector<8x128xf32>
    %cst_13 = arith.constant 0.000000e+00 : f32
    %32 = vector.broadcast %cst_13 : f32 to vector<8x128xf32>
    %33 = arith.maximumf %31, %32 : vector<8x128xf32>
    %c0_14 = arith.constant 0 : index
    %c0_15 = arith.constant 0 : index
    %34 = vector.load %arg5[%c0_14, %c0_15] : memref<128x128xf32, #tpu.memory_space<vmem>>, vector<128x128xf32>
    %cst_16 = arith.constant dense<0.000000e+00> : vector<8x128xf32>
    %35 = tpu.matmul %33, %34, %cst_16 {dimension_numbers = #tpu.dot_dimension_numbers<[1], [0], [0], [1], [0, 0, 1, 1], [], []>} : vector<8x128xf32>, vector<128x128xf32>, vector<8x128xf32> -> vector<8x128xf32>
    %c0_17 = arith.constant 0 : index
    %c0_18 = arith.constant 0 : index
    %36 = vector.load %arg6[%c0_17, %c0_18] : memref<1x128xf32, #tpu.memory_space<vmem>>, vector<1x128xf32>
    %37 = vector.broadcast %36 : vector<1x128xf32> to vector<8x128xf32>
    %38 = arith.addf %35, %37 : vector<8x128xf32>
    %c0_19 = arith.constant 0 : index
    %c0_20 = arith.constant 0 : index
    %39 = vector.load %arg7[%c0_19, %c0_20] : memref<8x128xf32, #tpu.memory_space<vmem>>, vector<8x128xf32>
    tpu.vector_store %arg7[%c0_19, %c0_20], %38 {strides = array<i32>} : memref<8x128xf32, #tpu.memory_space<vmem>>, vector<8x128xf32>,
    return
  }
  func.func @transform_0(%arg0: i32) -> (i32, i32, i32) {
    %c0_i32 = arith.constant 0 : i32
    %c0_i32_0 = arith.constant 0 : i32
    %c0_i32_1 = arith.constant 0 : i32
    return %arg0, %c0_i32, %c0_i32_0 : i32, i32, i32
  }
  func.func @transform_1(%arg0: i32) -> (i32, i32) {
    %c0_i32 = arith.constant 0 : i32
    %c0_i32_0 = arith.constant 0 : i32
    %c0_i32_1 = arith.constant 0 : i32
    return %c0_i32, %c0_i32_0 : i32, i32
  }
  func.func @transform_2(%arg0: i32) -> (i32, i32) {
    %c0_i32 = arith.constant 0 : i32
    %c0_i32_0 = arith.constant 0 : i32
    %c0_i32_1 = arith.constant 0 : i32
    return %c0_i32, %c0_i32_0 : i32, i32
  }
  func.func @transform_3(%arg0: i32) -> (i32, i32) {
    %c0_i32 = arith.constant 0 : i32
    %c0_i32_0 = arith.constant 0 : i32
    %c0_i32_1 = arith.constant 0 : i32
    return %c0_i32, %c0_i32_0 : i32, i32
  }
  func.func @transform_4(%arg0: i32) -> (i32, i32) {
    %c0_i32 = arith.constant 0 : i32
    %c0_i32_0 = arith.constant 0 : i32
    %c0_i32_1 = arith.constant 0 : i32
    return %c0_i32, %c0_i32_0 : i32, i32
  }
  func.func @transform_5(%arg0: i32) -> (i32, i32) {
    %c0_i32 = arith.constant 0 : i32
    %c0_i32_0 = arith.constant 0 : i32
    %c0_i32_1 = arith.constant 0 : i32
    return %c0_i32, %c0_i32_0 : i32, i32
  }
  func.func @transform_6(%arg0: i32) -> (i32, i32) {
    %c0_i32 = arith.constant 0 : i32
    %c0_i32_0 = arith.constant 0 : i32
    return %arg0, %c0_i32 : i32, i32
  }
}

</mosaic_0001>

<bundles_post_ra>
// kernel: cnn_forward.1
= control target key start
LH: loop header
LB: loop body
LE: loop exit
PB: predicated region body
PF: predicated region fallthrough
CT: control target
= control target key end

     0   :  { %vm96_vm0 = vcmask 261120   ;;  %vm71_vm1 = vcmask 1046528   ;;  %vm339_vm2 = vcmask 1045504   ;;  %vm493_vm3 = vcmask 1044480   ;;  %s1495_s1 = inlined_call_operand.vmem [shape: f32[128,128], index: 1, kind: input, shape index: {}]   ;;  %s1496_s0 = inlined_call_operand.vmem [shape: f32[8,11,32], index: 0, kind: input, shape index: {}]   ;;  %s1497_s4 = inlined_call_operand.vmem [shape: f32[128,128], index: 4, kind: input, shape index: {}]   ;;  %s1498_s3 = inlined_call_operand.vmem [shape: f32[8,128], index: 3, kind: input, shape index: {}]   ;;  %s1499_s2 = inlined_call_operand.vmem [shape: f32[1,128], index: 2, kind: input, shape index: {}]   ;;  %s1500_s5 = inlined_call_operand.vmem [shape: f32[1,128], index: 5, kind: input, shape index: {}]   ;;  %s1501_s6 = inlined_call_operand.vmem [shape: f32[8,128], index: 6, kind: output, shape index: {}]  }
   0x1   :  { %v39_v0 = vld [vmem:[%s1495_s1] sm:$0xff]  ;;  %v40_v1 = vld [vmem:[%s1495_s1 + $0x8] sm:$0xff]  ;;  %v41_v2 = vld [vmem:[%s1495_s1 + $0x10] sm:$0xff]  ;;  %vm1153_vm4 = vmmov 0   ;;  %vm759_vm5 = vcmask 1041409   ;;  %vm762_vm6 = vcmask 1042434  }
   0x2   :  { %v1077_v3 = vpack.c.bf16 %v40_v1, %v39_v0  ;;  %v42_v4 = vld [vmem:[%s1495_s1 + $0x18] sm:$0xff]  ;;  %v1205_v5 = vld [vmem:[%s1496_s0] sm:$0xff]  ;;  %v48_v8 = vld [vmem:[%s1495_s1 + $0x48] sm:$0xff]  ;;  %vm765_vm7 = vcmask 1043459   ;;  %vm768_vm8 = vcmask 1044484   ;;  %vm771_vm9 = vcmask 1045509  }
   0x3   :  { %v1081_v6 = vpack.c.bf16 %v42_v4, %v41_v2  ;;  %982 = vmatprep.mubr.msk.f32.mxu0 %vm96_vm0, %v1205_v5  ;;  %v47_v7 = vld [vmem:[%s1495_s1 + $0x40] sm:$0xff]  ;;  %v49_v10 = vld [vmem:[%s1495_s1 + $0x50] sm:$0xff]  ;;  %v50_v11 = vld [vmem:[%s1495_s1 + $0x58] sm:$0xff]  ;;  %v72_v30 = vrot.slane %v1205_v5, 1  ;;  %v340_v37 = vrot.slane %v1205_v5, 2  ;;  %vm774_vm10 = vcmask 1046534  }
   0x4   :  { %1078 = vmatprep.subr.bf16.mxu0 %v1077_v3  ;;  %v1085_v9 = vpack.c.bf16 %v48_v8, %v47_v7  ;;  %v1224_v12 = vld [vmem:[%s1496_s0 + $0x10] sm:$0xff]  ;;  %v43_v13 = vld [vmem:[%s1495_s1 + $0x20] sm:$0xff]  ;;  %v1089_v15 = vpack.c.bf16 %v50_v11, %v49_v10  ;;  %v52_v17 = vld [vmem:[%s1495_s1 + $0x68] sm:$0xff]  ;;  %vm777_vm11 = vcmask 1047559  }
   0x5   :  { %1080 = vmatpush3.bf16.msra.mxu0 %v1077_v3  ;;  %v1232_v14 = vld [vmem:[%s1496_s0 + $0x20] sm:$0xff]  ;;  %v44_v18 = vld [vmem:[%s1495_s1 + $0x28] sm:$0xff]  ;;  %v45_v20 = vld [vmem:[%s1495_s1 + $0x30] sm:$0xff]  ;;  %v75_v23 = vrot.slane %v1224_v12, 1  ;;  %v343_v48 = vrot.slane %v1224_v12, 2 }
   0x6   :  { %1082 = vmatprep.subr.bf16.mxu0 %v1081_v6  ;;  %v51_v16 = vld [vmem:[%s1495_s1 + $0x60] sm:$0xff]  ;;  %v1069_v19 = vpack.c.bf16 %v44_v18, %v43_v13  ;;  %v1253_v21 = vld [vmem:[%s1496_s0 + $0x30] sm:$0xff]  ;;  %v46_v22 = vld [vmem:[%s1495_s1 + $0x38] sm:$0xff]  ;;  %v78_v32 = vrot.slane %v1232_v14, 1  ;;  %v346_v51 = vrot.slane %v1232_v14, 2 }
   0x7   :  { %v1262_v24 = vld [vmem:[%s1496_s0 + $0x40] sm:$0xff]  ;;  %v1267_v25 = vld [vmem:[%s1496_s0 + $0x8] sm:$0x7]  ;;  %v1269_v26 = vpack.c.bf16 %v52_v17, %v51_v16  ;;  %v1073_v27 = vpack.c.bf16 %v46_v22, %v45_v20  ;;  %v1274_v28 = vld [vmem:[%s1496_s0 + $0x18] sm:$0x7]  ;;  %v81_v41 = vrot.slane %v1253_v21, 1 }
   0x8   :  { %1070 = vmatprep.subr.bf16.mxu1 %v1069_v19  ;;  %v1279_v29 = vld [vmem:[%s1496_s0 + $0x28] sm:$0x7]  ;;  %v73_v31 = vrot.slane %v1267_v25, 1  ;;  %v76_v33 = vrot.slane %v1274_v28, 1  ;;  %v1293_v35 = vld [vmem:[%s1496_s0 + $0x50] sm:$0xff]  ;;  %v1300_v38 = vld [vmem:[%s1496_s0 + $0x60] sm:$0xff] }
   0x9   :  { %1084 = vmatpush3.bf16.msra.mxu0 %v1081_v6  ;;  %1072 = vmatpush3.bf16.msra.mxu1 %v1069_v19  ;;  %v79_v34 = vrot.slane %v1279_v29, 1  ;;  %v341_v39 = vrot.slane %v1267_v25, 2  ;;  %v1307_v40 = vld [vmem:[%s1496_s0 + $0x38] sm:$0x7]  ;;  %v1314_v42 = vld [vmem:[%s1496_s0 + $0x48] sm:$0x7] }
   0xa   :  { %1086 = vmatprep.subr.bf16.mxu0 %v1085_v9  ;;  %1074 = vmatprep.subr.bf16.mxu1 %v1073_v27  ;;  %v74_v36 = vsel %vm71_vm1, %v72_v30, %v73_v31  ;;  %v77_v43 = vsel %vm71_vm1, %v75_v23, %v76_v33  ;;  %v82_v44 = vrot.slane %v1307_v40, 1  ;;  %v84_v45 = vrot.slane %v1262_v24, 1  ;;  %v1329_v49 = vld [vmem:[%s1496_s0 + $0x70] sm:$0xff]  ;;  %v1338_v54 = vld [vmem:[%s1496_s0 + $0x58] sm:$0x7] }
   0xb   :  { %962 = vmatprep.mubr.msk.f32.mxu1 %vm96_vm0, %v74_v36  ;;  %v80_v46 = vsel %vm71_vm1, %v78_v32, %v79_v34  ;;  %v85_v47 = vrot.slane %v1314_v42, 1  ;;  %v344_v50 = vrot.slane %v1274_v28, 2  ;;  %v342_v52 = vsel %vm339_vm2, %v340_v37, %v341_v39  ;;  %v53_v56 = vld [vmem:[%s1495_s1 + $0x70] sm:$0xff]  ;;  %v54_v57 = vld [vmem:[%s1495_s1 + $0x78] sm:$0xff]  ;;  %v1351_v58 = vld [vmem:[%s1496_s0 + $0x68] sm:$0x7] }
   0xc   :  { %983 = vmatmul.mubr.msk.f32.vlgmr.msra.gmra.mrb[0].mxu0 %vm96_vm0, %v1224_v12  ;;  %v347_v53 = vrot.slane %v1279_v29, 2  ;;  %v87_v55 = vrot.slane %v1293_v35, 1  ;;  %v83_v59 = vsel %vm71_vm1, %v81_v41, %v82_v44  ;;  %v88_v60 = vrot.slane %v1338_v54, 1  ;;  %v1371_v8 = vld [vmem:[%s1496_s0 + $0x78] sm:$0x7] }
   0xd   :  { %1088 = vmatpush3.bf16.msra.mxu0 %v1085_v9  ;;  %985 = vmatprep.mubr.msk.f32.mxu0 %vm96_vm0, %v1232_v14  ;;  %v90_v61 = vrot.slane %v1300_v38, 1  ;;  %v86_v62 = vsel %vm71_vm1, %v84_v45, %v85_v47  ;;  %v91_v63 = vrot.slane %v1351_v58, 1  ;;  %v349_v0 = vrot.slane %v1253_v21, 2 }
   0xe   :  { %1090 = vmatprep.subr.bf16.mxu0 %v1089_v15  ;;  %1076 = vmatpush3.bf16.msra.mxu1 %v1073_v27  ;;  %v345_v1 = vsel %vm339_vm2, %v343_v48, %v344_v50  ;;  %v350_v2 = vrot.slane %v1307_v40, 2  ;;  %v352_v3 = vrot.slane %v1262_v24, 2  ;;  %v348_v4 = vsel %vm339_vm2, %v346_v51, %v347_v53  ;;  %v727_v48 = vld [vmem:[%s1497_s4] sm:$0xff]  ;;  %v730_v53 = vld [vmem:[%s1497_s4 + $0x18] sm:$0xff] }
   0xf   :  { %v353_v6 = vrot.slane %v1314_v42, 2  ;;  %v1097_v7 = vpack.c.bf16 %v54_v57, %v53_v56  ;;  %v93_v9 = vrot.slane %v1329_v49, 1  ;;  %v89_v10 = vsel %vm71_vm1, %v87_v55, %v88_v60  ;;  %v731_v55 = vld [vmem:[%s1497_s4 + $0x20] sm:$0xff]  ;;  %v732_v56 = vld [vmem:[%s1497_s4 + $0x28] sm:$0xff] }
  0x10   :  { %986 = vmatmul.mubr.msk.f32.gmra.mrb[2].mxu0 %vm96_vm0, %v1253_v21  ;;  %v94_v11 = vrot.slane %v1371_v8, 1  ;;  %v92_v13 = vsel %vm71_vm1, %v90_v61, %v91_v63  ;;  %v351_v16 = vsel %vm339_vm2, %v349_v0, %v350_v2  ;;  %v356_v17 = vrot.slane %v1338_v54, 2  ;;  %v735_v61 = vld [vmem:[%s1497_s4 + $0x40] sm:$0xff]  ;;  %v737_v0 = vld [vmem:[%s1497_s4 + $0x50] sm:$0xff] }
  0x11   :  { %988 = vmatprep.mubr.msk.f32.mxu0 %vm96_vm0, %v1262_v24  ;;  %1092 = vmatpush3.bf16.msra.mxu0 %v1089_v15  ;;  %v355_v15 = vrot.slane %v1293_v35, 2  ;;  %v358_v18 = vrot.slane %v1300_v38, 2  ;;  %v354_v19 = vsel %vm339_vm2, %v352_v3, %v353_v6  ;;  %v359_v20 = vrot.slane %v1351_v58, 2  ;;  %v739_v3 = vld [vmem:[%s1497_s4 + $0x60] sm:$0xff] }
  0x12   :  { %1094 = vmatprep.subr.bf16.mxu0 %v1269_v26  ;;  %963 = vmatmul.mubr.msk.f32.vlgmr.msra.gmra.mrb[0].mxu1 %vm96_vm0, %v77_v43  ;;  %v95_v22 = vsel %vm71_vm1, %v93_v9, %v94_v11  ;;  %v361_v23 = vrot.slane %v1329_v49, 2  ;;  %v362_v27 = vrot.slane %v1371_v8, 2  ;;  %v494_v30 = vrot.slane %v1205_v5, 3 }
  0x13   :  { %965 = vmatprep.mubr.msk.f32.mxu1 %vm96_vm0, %v80_v46  ;;  %v360_v31 = vsel %vm339_vm2, %v358_v18, %v359_v20  ;;  %v495_v32 = vrot.slane %v1267_v25, 3  ;;  %v497_v33 = vrot.slane %v1224_v12, 3  ;;  %v498_v36 = vrot.slane %v1274_v28, 3 }
  0x14   :  { %989 = vmatmul.mubr.msk.f32.gmra.mrb[4].mxu0 %vm96_vm0, %v1293_v35  ;;  %v363_v34 = vsel %vm339_vm2, %v361_v23, %v362_v27  ;;  %v500_v37 = vrot.slane %v1232_v14, 3  ;;  %v501_v39 = vrot.slane %v1279_v29, 3  ;;  %v503_v25 = vrot.slane %v1253_v21, 3  ;;  %v647_v23 = vld [vmem:[%s1498_s3] sm:$0xff] }
  0x15   :  { %991 = vmatprep.mubr.msk.f32.mxu0 %vm96_vm0, %v1300_v38  ;;  %v496_v5 = vsel %vm493_vm3, %v494_v30, %v495_v32  ;;  %v499_v12 = vsel %vm493_vm3, %v497_v33, %v498_v36  ;;  %v504_v41 = vrot.slane %v1307_v40, 3  ;;  %v506_v43 = vrot.slane %v1262_v24, 3 }
  0x16   :  { %966 = vmatmul.mubr.msk.f32.gmra.mrb[2].mxu1 %vm96_vm0, %v83_v59  ;;  %v502_v28 = vsel %vm493_vm3, %v500_v37, %v501_v39  ;;  %v507_v14 = vrot.slane %v1314_v42, 3  ;;  %v509_v29 = vrot.slane %v1293_v35, 3  ;;  %v510_v44 = vrot.slane %v1338_v54, 3  ;;  %v734_v59 = vld [vmem:[%s1497_s4 + $0x38] sm:$0xff] }
  0x17   :  { %968 = vmatprep.mubr.msk.f32.mxu1 %vm96_vm0, %v86_v62  ;;  %v505_v21 = vsel %vm493_vm3, %v503_v25, %v504_v41  ;;  %v512_v45 = vrot.slane %v1300_v38, 3  ;;  %v513_v24 = vrot.slane %v1351_v58, 3  ;;  %v515_v42 = vrot.slane %v1329_v49, 3  ;;  %v733_v58 = vld [vmem:[%s1497_s4 + $0x30] sm:$0xff]  ;;  %v736_v62 = vld [vmem:[%s1497_s4 + $0x48] sm:$0xff] }
  0x18   :  { %992 = vmatmul.mubr.msk.f32.gmra.mrb[6].mxu0 %vm96_vm0, %v1329_v49  ;;  %v508_v40 = vsel %vm493_vm3, %v506_v43, %v507_v14  ;;  %v511_v35 = vsel %vm493_vm3, %v509_v29, %v510_v44  ;;  %v516_v46 = vrot.slane %v1371_v8, 3  ;;  %v728_v49 = vld [vmem:[%s1497_s4 + $0x8] sm:$0xff]  ;;  %v1152_v51 = vmov 0.0|0.0   ;;  %v742_v8 = vld [vmem:[%s1497_s4 + $0x78] sm:$0xff] }
  0x19   :  { %1002 = vmatprep.mubr.msk.f32.mxu0 %vm96_vm0, %v342_v52  ;;  %v514_v47 = vsel %vm493_vm3, %v512_v45, %v513_v24  ;;  %v1102_v50 = vpack.c.bf16 %v728_v49, %v727_v48  ;;  %1101 = vmatprep.subr.bf16.mxu1 %v1152_v51  ;;  %v729_v52 = vld [vmem:[%s1497_s4 + $0x10] sm:$0xff]  ;;  %v1108_v57 = vpack.c.bf16 %v732_v56, %v731_v55  ;;  %v887_v55 = vld [vmem:[%s1499_s2] ss:$0 sm:$0xff] }
  0x1a   :  { %969 = vmatmul.mubr.msk.f32.gmra.mrb[4].mxu1 %vm96_vm0, %v89_v10  ;;  %v517_v38 = vsel %vm493_vm3, %v515_v42, %v516_v46  ;;  %v1105_v54 = vpack.c.bf16 %v730_v53, %v729_v52  ;;  %v1111_v60 = vpack.c.bf16 %v734_v59, %v733_v58  ;;  %v1114_v63 = vpack.c.bf16 %v736_v62, %v735_v61 }
  0x1b   :  { %971 = vmatprep.mubr.msk.f32.mxu1 %vm96_vm0, %v92_v13  ;;  %1103 = vmatpush3.bf16.msra.mxu1 %v1102_v50  ;;  %v1154_v10 = vmov 0.0  }
  0x1c   :  { %1003 = vmatmul.mubr.msk.f32.vlgmr.msra.gmra.mrb[0].mxu0 %vm96_vm0, %v345_v1  ;;  %1104 = vmatprep.subr.bf16.mxu1 %v1152_v51  ;;  %v738_v1 = vld [vmem:[%s1497_s4 + $0x58] sm:$0xff] }
  0x1d   :  { %1096 = vmatpush3.bf16.msra.mxu0 %v1269_v26  ;;  %1005 = vmatprep.mubr.msk.f32.mxu0 %vm96_vm0, %v348_v4  ;;  %v357_v26 = vsel %vm339_vm2, %v355_v15, %v356_v17  ;;  %v1117_v2 = vpack.c.bf16 %v738_v1, %v737_v0  ;;  %v740_v4 = vld [vmem:[%s1497_s4 + $0x68] sm:$0xff] }
  0x1e   :  { %1098 = vmatprep.subr.bf16.mxu0 %v1097_v7  ;;  %972 = vmatmul.mubr.msk.f32.gmra.mrb[6].mxu1 %vm96_vm0, %v95_v22  ;;  %v1120_v6 = vpack.c.bf16 %v740_v4, %v739_v3 }
  0x1f   :  { %1106 = vmatpush3.bf16.msra.mxu1 %v1105_v54  ;;  %1066 = vmatprep.mubr.msk.f32.mxu1 %vm1153_vm4, %v1154_v10 }
  0x20   :  { %1006 = vmatmul.mubr.msk.f32.gmra.mrb[2].mxu0 %vm96_vm0, %v351_v16  ;;  %1107 = vmatprep.subr.bf16.mxu1 %v1152_v51 }
  0x21   :  { %1008 = vmatprep.mubr.msk.f32.mxu0 %vm96_vm0, %v354_v19  ;;  %1100 = vmatpush3.bf16.msra.mxu0 %v1097_v7  ;;  %v741_v7 = vld [vmem:[%s1497_s4 + $0x70] sm:$0xff] }
  0x22   :  { %v1123_v9 = vpack.c.bf16 %v742_v8, %v741_v7 }
  0x23   :  { %1109 = vmatpush3.bf16.msra.mxu1 %v1108_v57 }
  0x24   :  { %1009 = vmatmul.mubr.msk.f32.gmra.mrb[4].mxu0 %vm96_vm0, %v357_v26  ;;  %1110 = vmatprep.subr.bf16.mxu1 %v1152_v51 }
  0x25   :  { %1011 = vmatprep.mubr.msk.f32.mxu0 %vm96_vm0, %v360_v31 }
  0x27   :  { %1112 = vmatpush3.bf16.msra.mxu1 %v1111_v60 }
  0x28   :  { %1012 = vmatmul.mubr.msk.f32.gmra.mrb[6].mxu0 %vm96_vm0, %v363_v34  ;;  %1113 = vmatprep.subr.bf16.mxu1 %v1152_v51 }
  0x29   :  { %1022 = vmatprep.mubr.msk.f32.mxu0 %vm96_vm0, %v496_v5 }
  0x2b   :  { %1115 = vmatpush3.bf16.msra.mxu1 %v1114_v63 }
  0x2c   :  { %1023 = vmatmul.mubr.msk.f32.vlgmr.msra.gmra.mrb[0].mxu0 %vm96_vm0, %v499_v12  ;;  %1116 = vmatprep.subr.bf16.mxu1 %v1152_v51 }
  0x2d   :  { %1025 = vmatprep.mubr.msk.f32.mxu0 %vm96_vm0, %v502_v28 }
  0x2f   :  { %1118 = vmatpush3.bf16.msra.mxu1 %v1117_v2 }
  0x30   :  { %1026 = vmatmul.mubr.msk.f32.gmra.mrb[2].mxu0 %vm96_vm0, %v505_v21  ;;  %1119 = vmatprep.subr.bf16.mxu1 %v1152_v51 }
  0x31   :  { %1028 = vmatprep.mubr.msk.f32.mxu0 %vm96_vm0, %v508_v40 }
  0x33   :  { %1121 = vmatpush3.bf16.msra.mxu1 %v1120_v6 }
  0x34   :  { %1029 = vmatmul.mubr.msk.f32.gmra.mrb[4].mxu0 %vm96_vm0, %v511_v35  ;;  %1122 = vmatprep.subr.bf16.mxu1 %v1152_v51 }
  0x35   :  { %1031 = vmatprep.mubr.msk.f32.mxu0 %vm96_vm0, %v514_v47 }
  0x37   :  { %1124 = vmatpush3.bf16.msra.mxu1 %v1123_v9 }
  0x38   :  { %1032 = vmatmul.mubr.msk.f32.gmra.mrb[6].mxu0 %vm96_vm0, %v517_v38 }
  0xe5   :  { %v964_v11 = vpop.f32.mrb[0].mxu1 }
  0xe6   :  { %v179_v13 = vpop.f32.mrb[1].mxu1 }
  0xe9   :  { %v967_v15 = vpop.f32.mrb[2].mxu1 }
  0xea   :  { %v189_v16 = vpop.f32.mrb[3].mxu1 }
  0xed   :  { %v970_v17 = vpop.f32.mrb[4].mxu1 }
  0xee   :  { %v199_v18 = vpop.f32.mrb[5].mxu1 }
  0xf1   :  { %v973_v19 = vpop.f32.mrb[6].mxu1 }
  0xf2   :  { %v209_v20 = vpop.f32.mrb[7].mxu1 }
  0xff   :  { %v1024_v22 = vpop.f32.mrb[0].mxu0 }
 0x100   :  { %v1125_v26 = vadd.f32 %v1024_v22, %v964_v11  ;;  %v600_v27 = vpop.f32.mrb[1].mxu0 }
 0x101   :  { %v1126_v30 = vadd.f32 %v600_v27, %v179_v13 }
 0x102   :  { %v649_v31 = vadd.f32 %v1125_v26, %v647_v23 }
 0x103   :  { %v648_v32 = vadd.f32 %v1126_v30, %v647_v23  ;;  %v1027_v33 = vpop.f32.mrb[2].mxu0 }
 0x104   :  { %v662_v34 = vrot.slane %v649_v31, 4  ;;  %v1127_v36 = vadd.f32 %v1027_v33, %v967_v15  ;;  %v610_v37 = vpop.f32.mrb[3].mxu0 }
 0x105   :  { %v656_v5 = vrot.slane %v648_v32, 4  ;;  %v1128_v39 = vadd.f32 %v610_v37, %v189_v16 }
 0x106   :  { %v663_v25 = vmax.f32 %v649_v31, %v662_v34  ;;  %v651_v12 = vadd.f32 %v1127_v36, %v647_v23 }
 0x107   :  { %v657_v41 = vmax.f32 %v648_v32, %v656_v5  ;;  %v650_v43 = vadd.f32 %v1128_v39, %v647_v23  ;;  %v1030_v28 = vpop.f32.mrb[4].mxu0 }
 0x108   :  { %v664_v14 = vrot.slane %v663_v25, 2  ;;  %v674_v29 = vrot.slane %v651_v12, 4  ;;  %v1129_v21 = vadd.f32 %v1030_v28, %v970_v17  ;;  %v620_v44 = vpop.f32.mrb[5].mxu0 }
 0x109   :  { %v658_v45 = vrot.slane %v657_v41, 2  ;;  %v668_v40 = vrot.slane %v650_v43, 4  ;;  %v1130_v24 = vadd.f32 %v620_v44, %v199_v18 }
 0x10a   :  { %v665_v42 = vmax.f32 %v663_v25, %v664_v14  ;;  %v675_v35 = vmax.f32 %v651_v12, %v674_v29  ;;  %v653_v46 = vadd.f32 %v1129_v21, %v647_v23 }
 0x10b   :  { %v659_v47 = vmax.f32 %v657_v41, %v658_v45  ;;  %v669_v38 = vmax.f32 %v650_v43, %v668_v40  ;;  %v652_v48 = vadd.f32 %v1130_v24, %v647_v23  ;;  %v1033_v49 = vpop.f32.mrb[6].mxu0 }
 0x10c   :  { %v666_v50 = vrot.slane %v665_v42, 1  ;;  %v676_v51 = vrot.slane %v675_v35, 2  ;;  %v686_v52 = vrot.slane %v653_v46, 4  ;;  %v1131_v53 = vadd.f32 %v1033_v49, %v973_v19  ;;  %v630_v54 = vpop.f32.mrb[7].mxu0 }
 0x10d   :  { %v660_v56 = vrot.slane %v659_v47, 1  ;;  %v670_v57 = vrot.slane %v669_v38, 2  ;;  %v680_v58 = vrot.slane %v652_v48, 4  ;;  %v1132_v59 = vadd.f32 %v630_v54, %v209_v20 }
 0x10e   :  { %v667_v60 = vmax.f32 %v665_v42, %v666_v50  ;;  %v677_v61 = vmax.f32 %v675_v35, %v676_v51  ;;  %v687_v62 = vmax.f32 %v653_v46, %v686_v52  ;;  %v655_v63 = vadd.f32 %v1131_v53, %v647_v23 }
 0x10f   :  { %v661_v0 = vmax.f32 %v659_v47, %v660_v56  ;;  %v671_v1 = vmax.f32 %v669_v38, %v670_v57  ;;  %v681_v2 = vmax.f32 %v652_v48, %v680_v58  ;;  %v654_v3 = vadd.f32 %v1132_v59, %v647_v23  ;;  %v888_v59 = vld [vmem:[%s1500_s5] ss:$0 sm:$0xff] }
 0x110   :  { %v712_v4 = vadd.f32 %v887_v55, %v667_v60  ;;  %v678_v6 = vrot.slane %v677_v61, 1  ;;  %v688_v7 = vrot.slane %v687_v62, 2  ;;  %v698_v8 = vrot.slane %v655_v63, 4 }
 0x111   :  { %v711_v9 = vadd.f32 %v887_v55, %v661_v0  ;;  %v672_v10 = vrot.slane %v671_v1, 1  ;;  %v682_v11 = vrot.slane %v681_v2, 2  ;;  %v692_v13 = vrot.slane %v654_v3, 4 }
 0x112   :  { %v720_v15 = vmax.f32 %v712_v4, 0.0  ;;  %v679_v16 = vmax.f32 %v677_v61, %v678_v6  ;;  %v689_v17 = vmax.f32 %v687_v62, %v688_v7  ;;  %v699_v18 = vmax.f32 %v655_v63, %v698_v8 }
 0x113   :  { %v719_v19 = vmax.f32 %v711_v9, 0.0  ;;  %v673_v20 = vmax.f32 %v671_v1, %v672_v10  ;;  %v683_v22 = vmax.f32 %v681_v2, %v682_v11  ;;  %v693_v26 = vmax.f32 %v654_v3, %v692_v13 }
 0x114   :  { %v758_v27 = vrot.slane %v720_v15, 7  ;;  %v714_v30 = vadd.f32 %v887_v55, %v679_v16  ;;  %v690_v31 = vrot.slane %v689_v17, 1  ;;  %v700_v23 = vrot.slane %v699_v18, 2 }
 0x115   :  { %v713_v32 = vadd.f32 %v887_v55, %v673_v20  ;;  %v684_v33 = vrot.slane %v683_v22, 1  ;;  %v694_v34 = vrot.slane %v693_v26, 2 }
 0x116   :  { %v760_v36 = vsel %vm759_vm5, %v758_v27, %v719_v19  ;;  %v722_v37 = vmax.f32 %v714_v30, 0.0  ;;  %v691_v5 = vmax.f32 %v689_v17, %v690_v31  ;;  %v701_v39 = vmax.f32 %v699_v18, %v700_v23 }
 0x117   :  { %v721_v25 = vmax.f32 %v713_v32, 0.0  ;;  %v685_v12 = vmax.f32 %v683_v22, %v684_v33  ;;  %v695_v41 = vmax.f32 %v693_v26, %v694_v34 }
 0x118   :  { %v716_v43 = vadd.f32 %v887_v55, %v691_v5  ;;  %v702_v28 = vrot.slane %v701_v39, 1  ;;  %v764_v44 = vrot.slane %v722_v37, 5 }
 0x119   :  { %v761_v14 = vrot.slane %v721_v25, 6  ;;  %v715_v29 = vadd.f32 %v887_v55, %v685_v12  ;;  %v696_v21 = vrot.slane %v695_v41, 1 }
 0x11a   :  { %v724_v45 = vmax.f32 %v716_v43, 0.0  ;;  %v703_v40 = vmax.f32 %v701_v39, %v702_v28 }
 0x11b   :  { %v763_v24 = vsel %vm762_vm6, %v761_v14, %v760_v36  ;;  %v723_v42 = vmax.f32 %v715_v29, 0.0  ;;  %v697_v35 = vmax.f32 %v695_v41, %v696_v21 }
 0x11c   :  { %v718_v46 = vadd.f32 %v887_v55, %v703_v40  ;;  %v766_v47 = vsel %vm765_vm7, %v764_v44, %v763_v24  ;;  %v770_v49 = vrot.slane %v724_v45, 3 }
 0x11d   :  { %v767_v38 = vrot.slane %v723_v42, 4  ;;  %v717_v48 = vadd.f32 %v887_v55, %v697_v35 }
 0x11e   :  { %v726_v50 = vmax.f32 %v718_v46, 0.0 }
 0x11f   :  { %v725_v51 = vmax.f32 %v717_v48, 0.0  ;;  %v769_v52 = vsel %vm768_vm8, %v767_v38, %v766_v47 }
 0x120   :  { %v772_v53 = vsel %vm771_vm9, %v770_v49, %v769_v52  ;;  %v776_v56 = vrot.slane %v726_v50, 1 }
 0x121   :  { %v773_v54 = vrot.slane %v725_v51, 2 }
 0x123   :  { %v775_v57 = vsel %vm774_vm10, %v773_v54, %v772_v53 }
 0x124   :  { %v778_v58 = vsel %vm777_vm11, %v776_v56, %v775_v57 }
 0x125   :  { %1067 = vmatmul.mubr.f32.vlgmr.msra.gmra.mrb[8].mxu1 %v778_v58 }
 0x1f8   :  { %v846_v60 = vpop.f32.mrb[8].mxu1 }
 0x1f9   :  { %v847_v61 = vadd.f32 %v888_v59, %v846_v60  ;;  %v1068_v55 = vpop.f32.mrb[9].mxu1 }
 0x1fb   :  { %850 = vst [vmem:[%s1501_s6] sm:$0xff] %v847_v61 }

</bundles_post_ra>
